<compile_context>
chip_gen: v7x
topology: tpu7x:2x2x1
jax: 0.10.0
libtpu: 0.0.40
codegen_flags: <defaults>
</compile_context>

<pallas_src>
import functools

import jax
import jax.numpy as jnp
from jax import lax
from jax.experimental import pallas as pl
from jax.experimental.pallas import tpu as pltpu


# ----------------------------------------------------------------------------
# Device-dependent knobs.
# ----------------------------------------------------------------------------

def _device_kind() -> str:
    try:
        return jax.devices()[0].device_kind.lower()
    except Exception:
        return ""


def _is_256_mxu(kind: str) -> bool:
    # v6e / v7x: 2x256x256 MXU and a bf16 EUP path.  v4/v5e/v5p: 128-wide.
    return ("v6" in kind) or ("v7" in kind)


def _vmem_limit_bytes(kind: str) -> int:
    # Re-derive the scoped-VMEM limit per generation (v7x: 64 MiB/TC,
    # v5e/v6e: 128 MiB); leave ~3/8 headroom for compiler scratch & spills.
    try:
        cap = int(pltpu.get_tpu_info().vmem_capacity_bytes)
    except Exception:
        cap = (64 if "v7" in kind else 128) * 1024 * 1024
    if "v7" in kind:
        cap = min(cap, 64 * 1024 * 1024)
    return int(min(100 * 1024 * 1024, (cap * 5) // 8))


def _pick_tile(n: int, cap: int) -> int:
    """Largest tile <= cap that divides n (multiple of 8 when possible)."""
    if n <= cap:
        return n
    best = None
    for t in range(8, cap + 1, 8):
        if n % t == 0:
            best = t
    return best if best is not None else n


def _round_up(x: int, m: int) -> int:
    return ((x + m - 1) // m) * m


def _const_spec(shape, index_map):
    """Grid-invariant block (constant index_map): DMA'd exactly once.

    Request single buffering — default double buffering of a never-changing
    block is pure VMEM waste (matters most on v7x's 64 MiB).  Fall back
    gracefully if this JAX build does not expose BlockSpec.pipeline_mode.
    """
    try:
        return pl.BlockSpec(shape, index_map,
                            pipeline_mode=pl.Buffered(buffer_count=1))
    except (AttributeError, TypeError):
        return pl.BlockSpec(shape, index_map)


# ----------------------------------------------------------------------------
# K / V projection kernel (emits bf16, head-padded Kp / Vp).
# ----------------------------------------------------------------------------

def _proj_kernel(x_ref, w_ref, b_ref, o_ref):
    # o = (x @ w + b): bf16 MXU operands, f32 accumulation, bf16 out.
    o_ref[0] = (jnp.dot(x_ref[0], w_ref[...], preferred_element_type=jnp.float32)
                + b_ref[...]).astype(o_ref.dtype)


def _project_bf16(x, w, b, *, tile_s: int, vmem_limit: int):
    """x: [B, S, Hin] bf16, w: [Hin, Hout] bf16, b: [1, Hout] f32 -> [B, S, Hout] bf16."""
    B, S, Hin = x.shape
    Hout = w.shape[1]
    ts = _pick_tile(S, tile_s)
    return pl.pallas_call(
        _proj_kernel,
        out_shape=jax.ShapeDtypeStruct((B, S, Hout), jnp.bfloat16),
        grid_spec=pltpu.PrefetchScalarGridSpec(
            num_scalar_prefetch=0,
            grid=(B, S // ts),
            in_specs=[
                pl.BlockSpec((1, ts, Hin), lambda bi, si: (bi, si, 0)),
                _const_spec((Hin, Hout), lambda bi, si: (0, 0)),
                _const_spec((1, Hout), lambda bi, si: (0, 0)),
            ],
            out_specs=pl.BlockSpec((1, ts, Hout), lambda bi, si: (bi, si, 0)),
        ),
        compiler_params=pltpu.CompilerParams(
            dimension_semantics=("parallel", "parallel"),
            vmem_limit_bytes=vmem_limit,
        ),
    )(x, w, b)


# ----------------------------------------------------------------------------
# Flash multi-head attention kernel.
# ----------------------------------------------------------------------------

def _mha_flash_kernel(q_ref, kp_ref, vp_ref, wq_ref, bq_ref, wo_ref, bo_ref,
                      o_ref,
                      qp_sc, m_sc, l_sc, acc_sc, cat_sc,
                      *, head_size: int, d_pad: int, exp_dtype):
    ki = pl.program_id(2)
    n_kv = pl.num_programs(2)

    # ---- per-(batch, q-tile) init: first kv step ---------------------------
    @pl.when(ki == 0)
    def _():
        # Q projection for this q tile (softmax scale pre-folded into wq/bq),
        # written to a bf16 VMEM slab so per-head reads below are static,
        # lane-dense ref slices.
        qp = (jnp.dot(q_ref[0], wq_ref[...], preferred_element_type=jnp.float32)
              + bq_ref[...])
        qp_sc[...] = qp.astype(qp_sc.dtype)
        m_sc[...] = jnp.full(m_sc.shape, -jnp.inf, dtype=m_sc.dtype)
        l_sc[...] = jnp.zeros(l_sc.shape, dtype=l_sc.dtype)
        acc_sc[...] = jnp.zeros(acc_sc.shape, dtype=acc_sc.dtype)

    # Contract the per-head feature dim of q and k directly:
    # A[m, d] x B[n, d] -> [m, n]; no transposed copy of K.
    nt_dims = (((1,), (1,)), ((), ()))

    # Heads are unrolled (head_size is small).  With kv tiling the live f32
    # logits are bounded to [tq, tkv] per head, so the unroll does not blow
    # vreg live ranges.  TODO(synk): switch to lax.fori_loop with
    # pl.ds/pl.multiple_of ref slices if head_size ever grows large.
    for h in range(head_size):
        lo = h * d_pad
        hi = lo + d_pad
        qh = qp_sc[:, lo:hi]            # [tq,  d_pad] bf16, lane-dense
        kh = kp_ref[0, :, lo:hi]        # [tkv, d_pad] bf16, lane-dense
        vh = vp_ref[0, :, lo:hi]        # [tkv, d_pad] bf16, lane-dense

        s = lax.dot_general(qh, kh, nt_dims,
                            preferred_element_type=jnp.float32)    # [tq, tkv]

        m_prev = m_sc[h]                                            # [tq, 1]
        m_new = jnp.maximum(m_prev, jnp.max(s, axis=-1, keepdims=True))
        alpha = jnp.exp(m_prev - m_new)                             # f32, [tq, 1]
        p = jnp.exp((s - m_new).astype(exp_dtype))                  # bf16 EUP on v6e/v7x
        l_sc[h] = alpha * l_sc[h] + jnp.sum(p.astype(jnp.float32),
                                            axis=-1, keepdims=True)
        pv = jnp.dot(p.astype(jnp.bfloat16), vh,
                     preferred_element_type=jnp.float32)            # [tq, d_pad]
        acc_sc[:, lo:hi] = alpha * acc_sc[:, lo:hi] + pv
        m_sc[h] = m_new

    # ---- finalize: last kv step --------------------------------------------
    @pl.when(ki == n_kv - 1)
    def _():
        for h in range(head_size):
            lo = h * d_pad
            hi = lo + d_pad
            inv_l = pl.reciprocal(l_sc[h], approx=True)             # EUP slot
            cat_sc[:, lo:hi] = (acc_sc[:, lo:hi] * inv_l).astype(cat_sc.dtype)
        out = (jnp.dot(cat_sc[...], wo_ref[...],
                       preferred_element_type=jnp.float32) + bo_ref[...])
        o_ref[0] = out.astype(o_ref.dtype)


# ----------------------------------------------------------------------------
# Wrapper.
# ----------------------------------------------------------------------------

def multi_head_attention(q, k, v, params, *, head_size: int, out_dtype=None):
    """q, k, v: [B, S, H].  params: f32 weights in [H_in, H_out] layout
    (transposed w.r.t. torch.nn.Linear) and biases.  Returns [B, S, H]."""
    B, S, H = q.shape
    d = H // head_size
    scale = float(d) ** -0.5
    out_dtype = q.dtype if out_dtype is None else out_dtype

    kind = _device_kind()
    wide_mxu = _is_256_mxu(kind)
    vmem_limit = _vmem_limit_bytes(kind)

    # Pad the per-head feature dim d_k up to a lane-dense multiple of 128 by
    # zero-padding projection-weight columns and output-weight rows — a
    # mathematical no-op that turns every per-head slice / slab store into a
    # full-lane op and fills the MXU contraction depth.
    d_pad = _round_up(d, 128)
    HAp = head_size * d_pad

    def pad_out_proj(w, b):
        # w: [H, head_size*d] -> [H, head_size*d_pad]; b likewise.
        wp = jnp.pad(w.reshape(H, head_size, d), ((0, 0), (0, 0), (0, d_pad - d)))
        bp = jnp.pad(b.reshape(head_size, d), ((0, 0), (0, d_pad - d)))
        return wp.reshape(H, HAp), bp.reshape(1, HAp)

    def pad_in_proj(w):
        # wo: [head_size*d, H] -> [head_size*d_pad, H] (zero rows in padding).
        wp = jnp.pad(w.reshape(head_size, d, H), ((0, 0), (0, d_pad - d), (0, 0)))
        return wp.reshape(HAp, H)

    to_bf16 = lambda x: x.astype(jnp.bfloat16)

    # Softmax scale folded into the Q projection (weights AND bias).
    wq, bq = pad_out_proj(params["wq"] * scale, params["bq"] * scale)
    wk, bk = pad_out_proj(params["wk"], params["bk"])
    wv, bv = pad_out_proj(params["wv"], params["bv"])
    wo = pad_in_proj(params["wo"])
    bo = params["bo"].astype(jnp.float32).reshape(1, H)

    qb, kb, vb = to_bf16(q), to_bf16(k), to_bf16(v)
    wq_b, wk_b, wv_b, wo_b = to_bf16(wq), to_bf16(wk), to_bf16(wv), to_bf16(wo)
    bq_f = bq.astype(jnp.float32)
    bk_f = bk.astype(jnp.float32)
    bv_f = bv.astype(jnp.float32)

    # K / V projections hoisted into a small separate pallas_call: the
    # attention kernel never holds raw K/V or a full-[S, HAp] scratch.
    kp = _project_bf16(kb, wk_b, bk_f, tile_s=256, vmem_limit=vmem_limit)
    vp = _project_bf16(vb, wv_b, bv_f, tile_s=256, vmem_limit=vmem_limit)

    # Attention tiling: tq fills the 256-wide MXU on v6e/v7x, 128 on v5e/v5p;
    # the kv axis streams Kp/Vp tiles through the BlockSpec pipeline.
    tq = _pick_tile(S, 256 if wide_mxu else 128)
    tkv = _pick_tile(S, 256)
    n_q = S // tq
    n_kv = S // tkv

    exp_dtype = jnp.bfloat16 if wide_mxu else jnp.float32

    kernel = functools.partial(_mha_flash_kernel, head_size=head_size,
                               d_pad=d_pad, exp_dtype=exp_dtype)

    return pl.pallas_call(
        kernel,
        out_shape=jax.ShapeDtypeStruct((B, S, H), out_dtype),
        grid_spec=pltpu.PrefetchScalarGridSpec(
            num_scalar_prefetch=0,
            grid=(B, n_q, n_kv),
            in_specs=[
                pl.BlockSpec((1, tq, H), lambda b, qi, ki: (b, qi, 0)),      # raw Q
                pl.BlockSpec((1, tkv, HAp), lambda b, qi, ki: (b, ki, 0)),   # Kp tile
                pl.BlockSpec((1, tkv, HAp), lambda b, qi, ki: (b, ki, 0)),   # Vp tile
                _const_spec((H, HAp), lambda b, qi, ki: (0, 0)),             # wq
                _const_spec((1, HAp), lambda b, qi, ki: (0, 0)),             # bq
                _const_spec((HAp, H), lambda b, qi, ki: (0, 0)),             # wo
                _const_spec((1, H), lambda b, qi, ki: (0, 0)),               # bo
            ],
            out_specs=pl.BlockSpec((1, tq, H), lambda b, qi, ki: (b, qi, 0)),
            scratch_shapes=[
                pltpu.VMEM((tq, HAp), jnp.bfloat16),          # projected-Q slab
                pltpu.VMEM((head_size, tq, 1), jnp.float32),  # running max  m
                pltpu.VMEM((head_size, tq, 1), jnp.float32),  # running sum  l
                pltpu.VMEM((tq, HAp), jnp.float32),           # running PV accumulator
                pltpu.VMEM((tq, HAp), jnp.bfloat16),          # normalized head-concat slab
            ],
        ),
        compiler_params=pltpu.CompilerParams(
            # (batch, q-tile) are independent -> parallel (megacore even at
            # B == 1); the kv axis carries the online-softmax scratch ->
            # arbitrary, and is last so output writeback happens once per
            # (b, q-tile).
            dimension_semantics=("parallel", "parallel", "arbitrary"),
            vmem_limit_bytes=vmem_limit,
        ),
    )(qb, kp, vp, wq_b, bq_f, wo_b, bo)


# ----------------------------------------------------------------------------
# Pure-JAX reference + test.
# ----------------------------------------------------------------------------

def _reference(q, k, v, params, *, head_size: int):
    """Pure-JAX f32 reference mirroring the PyTorch forward (eval mode)."""
    B, S, H = q.shape
    d = H // head_size
    scale = float(d) ** -0.5

    def lin(x, w, b):
        return x @ w + b

    qp = lin(q, params["wq"], params["bq"]).reshape(B, S, head_size, d)
    kp = lin(k, params["wk"], params["bk"]).reshape(B, S, head_size, d)
    vp = lin(v, params["wv"], params["bv"]).reshape(B, S, head_size, d)

    qp = jnp.transpose(qp, (0, 2, 1, 3)) * scale      # [B, h, S, d]
    kp = jnp.transpose(kp, (0, 2, 3, 1))              # [B, h, d, S]
    vp = jnp.transpose(vp, (0, 2, 1, 3))              # [B, h, S, d]

    x = jnp.matmul(qp, kp)                            # [B, h, S, S]
    x = jax.nn.softmax(x, axis=3)
    x = jnp.matmul(x, vp)                             # [B, h, S, d]
    x = jnp.transpose(x, (0, 2, 1, 3)).reshape(B, S, head_size * d)
    return lin(x, params["wo"], params["bo"])


if __name__ == "__main__":
    # Small shapes consistent with the module: hidden=32, head_size=4 -> d_k=8.
    B, S, H = 2, 8, 32
    head_size = 4
    HA = H  # head_size * att_size == hidden_size here

    key = jax.random.PRNGKey(0)
    keys = jax.random.split(key, 12)

    q = jax.random.normal(keys[0], (B, S, H), dtype=jnp.float32)
    k = jax.random.normal(keys[1], (B, S, H), dtype=jnp.float32)
    v = jax.random.normal(keys[2], (B, S, H), dtype=jnp.float32)

    init = lambda kk, shape: (jax.random.normal(kk, shape, jnp.float32) * 0.05)
    params = {
        "wq": init(keys[3], (H, HA)), "bq": init(keys[4], (HA,)),
        "wk": init(keys[5], (H, HA)), "bk": init(keys[6], (HA,)),
        "wv": init(keys[7], (H, HA)), "bv": init(keys[8], (HA,)),
        "wo": init(keys[9], (HA, H)), "bo": init(keys[10], (H,)),
    }

    out = multi_head_attention(q, k, v, params, head_size=head_size)
    out = jax.block_until_ready(out)

    ref = _reference(q, k, v, params, head_size=head_size)
    assert out.shape == (B, S, H)
    # bf16 operands, bf16 exp (v6e/v7x) and approx reciprocal -> compare
    # against the f32 reference at bf16-level tolerance.
    assert jnp.allclose(out, ref, atol=3e-2, rtol=3e-2), (
        float(jnp.max(jnp.abs(out - ref))))

    print("KERNEL_OK")
</pallas_src>

<mosaic_0001>
module attributes {stable_mosaic.version = 11 : i64} {
  func.func @_proj_kernel(%arg0: i32, %arg1: i32, %arg2: memref<1x8x32xbf16, #tpu.memory_space<vmem>>, %arg3: memref<32x512xbf16, #tpu.memory_space<vmem>>, %arg4: memref<1x512xf32, #tpu.memory_space<vmem>>, %arg5: memref<1x8x512xbf16, #tpu.memory_space<vmem>>) attributes {dimension_semantics = [#tpu.dimension_semantics<parallel>, #tpu.dimension_semantics<parallel>], iteration_bounds = array<i64: 2, 1>, scalar_prefetch = 0 : i64, scratch_operands = 0 : i64, tpu.core_type = #tpu.core_type<tc>, window_params = [{transform_indices = @transform_0, window_bounds = array<i64: 1, 8, 32>}, {pipeline_mode = #tpu.pipeline_mode<synchronous>, transform_indices = @transform_1, window_bounds = array<i64: 32, 512>}, {pipeline_mode = #tpu.pipeline_mode<synchronous>, transform_indices = @transform_2, window_bounds = array<i64: 1, 512>}, {transform_indices = @transform_3, window_bounds = array<i64: 1, 8, 512>}]} {
    %c0 = arith.constant 0 : index
    %c0_0 = arith.constant 0 : index
    %c0_1 = arith.constant 0 : index
    %0 = vector.load %arg2[%c0, %c0_0, %c0_1] : memref<1x8x32xbf16, #tpu.memory_space<vmem>>, vector<1x8x32xbf16>
    %1 = vector.shape_cast %0 : vector<1x8x32xbf16> to vector<8x32xbf16>
    %c0_2 = arith.constant 0 : index
    %c0_3 = arith.constant 0 : index
    %2 = vector.load %arg3[%c0_2, %c0_3] : memref<32x512xbf16, #tpu.memory_space<vmem>>, vector<32x512xbf16>
    %cst = arith.constant dense<0.000000e+00> : vector<8x512xf32>
    %3 = tpu.matmul %1, %2, %cst {dimension_numbers = #tpu.dot_dimension_numbers<[1], [0], [0], [1], [0, 0, 1, 1], [], []>} : vector<8x32xbf16>, vector<32x512xbf16>, vector<8x512xf32> -> vector<8x512xf32>
    %c0_4 = arith.constant 0 : index
    %c0_5 = arith.constant 0 : index
    %4 = vector.load %arg4[%c0_4, %c0_5] : memref<1x512xf32, #tpu.memory_space<vmem>>, vector<1x512xf32>
    %5 = vector.broadcast %4 : vector<1x512xf32> to vector<8x512xf32>
    %6 = arith.addf %3, %5 : vector<8x512xf32>
    %7 = arith.truncf %6 : vector<8x512xf32> to vector<8x512xbf16>
    %c0_6 = arith.constant 0 : index
    %c0_7 = arith.constant 0 : index
    %c0_8 = arith.constant 0 : index
    %8 = vector.load %arg5[%c0_6, %c0_7, %c0_8] : memref<1x8x512xbf16, #tpu.memory_space<vmem>>, vector<1x8x512xbf16>
    %9 = vector.shape_cast %8 : vector<1x8x512xbf16> to vector<8x512xbf16>
    %10 = vector.shape_cast %7 : vector<8x512xbf16> to vector<1x8x512xbf16>
    tpu.vector_store %arg5[%c0_6, %c0_7, %c0_8], %10 {strides = array<i32>} : memref<1x8x512xbf16, #tpu.memory_space<vmem>>, vector<1x8x512xbf16>,
    return
  }
  func.func @transform_0(%arg0: i32, %arg1: i32) -> (i32, i32, i32) {
    %c0_i32 = arith.constant 0 : i32
    %c0_i32_0 = arith.constant 0 : i32
    return %arg0, %arg1, %c0_i32 : i32, i32, i32
  }
  func.func @transform_1(%arg0: i32, %arg1: i32) -> (i32, i32) {
    %c0_i32 = arith.constant 0 : i32
    %c0_i32_0 = arith.constant 0 : i32
    %c0_i32_1 = arith.constant 0 : i32
    return %c0_i32, %c0_i32_0 : i32, i32
  }
  func.func @transform_2(%arg0: i32, %arg1: i32) -> (i32, i32) {
    %c0_i32 = arith.constant 0 : i32
    %c0_i32_0 = arith.constant 0 : i32
    %c0_i32_1 = arith.constant 0 : i32
    return %c0_i32, %c0_i32_0 : i32, i32
  }
  func.func @transform_3(%arg0: i32, %arg1: i32) -> (i32, i32, i32) {
    %c0_i32 = arith.constant 0 : i32
    %c0_i32_0 = arith.constant 0 : i32
    return %arg0, %arg1, %c0_i32 : i32, i32, i32
  }
}

</mosaic_0001>

<bundles_post_ra>
// kernel: tpu_custom_call.1
= control target key start
LH: loop header
LB: loop body
LE: loop exit
PB: predicated region body
PF: predicated region fallthrough
CT: control target
= control target key end

     0   :  { %8 = vsyncpa [#allocation3], 0  ;;  %s1107_s0 = inlined_call_operand.hbm [shape: bf16[2,8,32], index: 0, kind: input, shape index: {}]   ;;  %s1108_s1 = inlined_call_operand.hbm [shape: bf16[32,512], index: 1, kind: input, shape index: {}]   ;;  %s1109_s2 = inlined_call_operand.hbm [shape: f32[1,512], index: 2, kind: input, shape index: {}]   ;;  %s1110_s3 = inlined_call_operand.hbm [shape: bf16[2,8,512], index: 3, kind: output, shape index: {}]  }
   0x1   :  { %10 = vsyncpa [#allocation3 + $0x1], 0 }
   0x2   :  { %11 = vsyncpa [#allocation6], 0 }
   0x3   :  { %12 = vsyncpa [#allocation4], 0 }
   0x4   :  { %14 = vsyncpa [#allocation4 + $0x1], 0  ;;  %s856_s12 = smov 0   ;;  %s858_s13 = smov 0  }
   0x5   :  { %s860_s14 = smov 0   ;;  %s862_s15 = smov 0  }
   0x6   :  { %s864_s16 = smov 0   ;;  %s866_s17 = smov 0  }
   0x7 LB: > { %s524_s18 = sadd.s32 4294967295, %s827_s17   ;;  %s525_s19 = sadd.s32 4294967294, %s827_s17   ;;  %s827_s17 = sphi %s866_s17, %s20_s17   ;;  %s823_s16 = sphi %s864_s16, %s1132_s16   ;;  %s819_s15 = sphi %s862_s15, %s1131_s15   ;;  %s815_s14 = sphi %s860_s14, %s1130_s14   ;;  %s811_s13 = sphi %s858_s13, %s1129_s13   ;;  %s807_s12 = sphi %s856_s12, %s1128_s12  }
   0x8   : > { %p54_p0 = scmp.ne.s32.totalorder %s811_s13, %s807_s12  ;;  %p890_p1 = scmp.eq.s32.totalorder %s524_s18, 0 }
   0x9   : > { %p894_p2 = scmp.eq.s32.totalorder %s524_s18, 1  ;;  %p128_p3 = scmp.eq.s32.totalorder %s525_s19, 1 }
   0xa   : > { %s1115_s20 = scalar_select %p890_p1, 1, 0 }
   0xb   : > { %p900_p4 = por %p890_p1, %p54_p0  ;;  %p526_p5 = scmp.ge.s32.totalorder %s827_s17, 1 }
   0xc   : > { %p905_p6 = por %p128_p3, %p54_p0  ;;  %p135_p7 = scmp.lt.s32.totalorder %s827_s17, 3 }
   0xd   : > { %s1117_s22 = scalar_select %p900_p4, 1, 0 }
   0xe   : > { %s1118_s23 = scalar_select %p905_p6, 1, 0 }
   0xf   : > { %p910_p8 = pnand %p526_p5, %p135_p7  ;;  %s829_s25 = smov [#allocation5]  }
  0x10   : > { %s147_s26 = sshll.u32 %s829_s25, 4  ;;  %s830_s28 = smov [#allocation7]   ;;  %s914_s26 = int_to_ptr.vmem [resolvable:$true] %s147_s26 }
  0x11   : > { %p569_p9 = pneg %p910_p8  ;;  %s161_s29 = sshll.u32 %s830_s28, 4  ;;  %s925_s29 = int_to_ptr.vmem [resolvable:$true] %s161_s29 }
  0x12   : > { %s655_s5 = scalar_lea.hbm %s1108_s1, 1024 }
  0x13   : > { %p921_p11 = pnand %p569_p9, %p890_p1  ;;  %p656_p12 = scmp.ne.s32.totalorder %s1108_s1, %s655_s5 }
  0x14   : > { %p662_p5 = scmp.lt.u32.totalorder %s655_s5, %s1108_s1 }
  0x15   : > { %p657_p13 = pneg %p921_p11 }
  0x17   : > { %p658_p0 = pnand %p657_p13, %p656_p12 }
  0x19   : > { %p659_p3 = pneg %p658_p0 }
  0x1b   : > { %p664_p7 = pnand %p662_p5, %p659_p3 }
  0x1d   : > { %667 = shalt.err (!%p664_p7)
}
  0x1e   : > { %s668_s10 = scalar_lea.vmem %s914_s26, 1024  ;;  %p676_p1 = scmp.lt.s32.totalorder %s914_s26, %s914_s26 }
  0x1f   : > { %p669_p9 = scmp.ne.s32.totalorder %s914_s26, %s668_s10  ;;  %p677_p12 = scmp.lt.s32.totalorder %s668_s10, %s668_s10 }
  0x21   : > { %p671_p10 = pnand %p669_p9, %p657_p13  ;;  %p678_p0 = por %p677_p12, %p676_p1 }
  0x23   : > { %p672_p6 = pneg %p671_p10 }
  0x25   : > { %p679_p4 = pnand %p678_p0, %p672_p6 }
  0x27   : > { %682 = shalt.err (!%p679_p4)
}
  0x28   : > { %s831_s11 = smov 256   ;;  %s832_s18 = smov 16  }
  0x29   : > { %572 = dma.hbm_to_vmem [thread:$0]  (!%p921_p11), %s1108_s1, 1024, %s914_s26, [#allocation6], %s831_s11, %s831_s11, %s832_s18  }
  0x2a   : > { %s683_s4 = scalar_lea.hbm %s1109_s2, 64 }
  0x2b   : > { %p684_p1 = scmp.ne.s32.totalorder %s1109_s2, %s683_s4  ;;  %p690_p10 = scmp.lt.u32.totalorder %s683_s4, %s1109_s2 }
  0x2d   : > { %p686_p4 = pnand %p684_p1, %p657_p13 }
  0x2f   : > { %p687_p6 = pneg %p686_p4 }
  0x31   : > { %p692_p3 = pnand %p690_p10, %p687_p6 }
  0x33   : > { %695 = shalt.err (!%p692_p3)
}
  0x34   : > { %s696_s26 = scalar_lea.vmem %s925_s29, 64  ;;  %p704_p12 = scmp.lt.s32.totalorder %s925_s29, %s925_s29 }
  0x35   : > { %p697_p5 = scmp.ne.s32.totalorder %s925_s29, %s696_s26  ;;  %p705_p0 = scmp.lt.s32.totalorder %s696_s26, %s696_s26 }
  0x37   : > { %p699_p7 = pnand %p697_p5, %p657_p13  ;;  %p706_p1 = por %p705_p0, %p704_p12 }
  0x39   : > { %p700_p9 = pneg %p699_p7 }
  0x3b   : > { %p707_p4 = pnand %p706_p1, %p700_p9 }
  0x3d   : > { %710 = shalt.err (!%p707_p4)
}
  0x3e   : > { %575 = dma.hbm_to_vmem [thread:$0]  (!%p921_p11), %s1109_s2, 64, %s925_s29, [#allocation6]  }
  0x3f   : > { %s32_s11 = sadd.s32 1, %s823_s16  ;;  %s41_s18 = sadd.s32 1, %s815_s14 }
  0x40   : > { %p34_p13 = scmp.ge.s32.totalorder %s32_s11, 2  ;;  %p48_p6 = scmp.ne.s32.totalorder %s815_s14, %s811_s13 }
  0x41   : > { %p49_p10 = scmp.eq.s32.totalorder %s827_s17, 0  ;;  %p586_p3 = scmp.lt.s32.totalorder %s827_s17, 2 }
  0x42   : > { %s1134_s11 = smov (%p34_p13, %s32_s11), 0  ;;  %p989_p7 = por %p894_p2, %p48_p6 }
  0x43   : > { %p50_p5 = por %p49_p10, %p48_p6  ;;  %s36_s19 = ssub.s32 %s823_s16, %s1134_s11 }
  0x44   : > { %s1121_s27 = scalar_select %p989_p7, 1, 0 }
  0x45   : > { %s172_s25 = sand.u32 1, %s815_s14   ;;  %p39_p9 = scmp.eq.s32.totalorder %s36_s19, 0 }
  0x46   : > { %s530_s29 = sshll.u32 %s172_s25, 2  ;;  %s531_s28 = sshll.u32 %s823_s16, 6 }
  0x47   : > { %s998_s30 = scalar_select %p39_p9, %s815_s14, %s41_s18  }
  0x48   : > { %s1003_s6 = scalar_lea.hbm %s1107_s0, %s531_s28  ;;  %s176_s21 = scalar_lea.vmem [#allocation2], %s530_s29 }
  0x49   : > { %s184_s7 = sshll.u32 %s176_s21, 4  ;;  %p1007_p2 = pnand %p586_p3, %p50_p5  ;;  %s1011_s7 = int_to_ptr.vmem [resolvable:$true] %s184_s7 }
  0x4a   : > { %s173_s26 = scalar_lea.sflag [#allocation3], %s172_s25  ;;  %s711_s9 = scalar_lea.hbm %s1003_s6, 64 }
  0x4b   : > { %p712_p11 = scmp.ne.s32.totalorder %s1003_s6, %s711_s9  ;;  %p713_p12 = pneg %p1007_p2 }
  0x4c   : > { %s716_s19 = scalar_lea.hbm %s1107_s0, 128  ;;  %p717_p4 = scmp.lt.u32.totalorder %s1003_s6, %s1107_s0 }
  0x4d   : > { %p714_p0 = pnand %p713_p12, %p712_p11  ;;  %p718_p13 = scmp.lt.u32.totalorder %s716_s19, %s711_s9 }
  0x4e   : > { %p720_p10 = scmp.lt.u32.totalorder %s711_s9, %s1003_s6 }
  0x4f   : > { %p715_p1 = pneg %p714_p0  ;;  %p719_p6 = por %p718_p13, %p717_p4 }
  0x51   : > { %p721_p3 = por %p720_p10, %p719_p6 }
  0x53   : > { %p722_p5 = pnand %p721_p3, %p715_p1 }
  0x55   : > { %725 = shalt.err (!%p722_p5)
}
  0x56   : > { %s726_s25 = scalar_lea.vmem %s1011_s7, 64  ;;  %s833_s4 = smov [#allocation2]  }
  0x57   : > { %p727_p9 = scmp.ne.s32.totalorder %s1011_s7, %s726_s25  ;;  %s731_s5 = sshll.u32 %s833_s4, 4  ;;  %s732_s5 = int_to_ptr.vmem [resolvable:$false] %s731_s5 }
  0x58   : > { %s733_s21 = scalar_lea.vmem %s732_s5, 128  ;;  %p734_p7 = scmp.lt.s32.totalorder %s1011_s7, %s732_s5 }
  0x59   : > { %p729_p11 = pnand %p727_p9, %p713_p12  ;;  %p735_p4 = scmp.lt.s32.totalorder %s733_s21, %s726_s25 }
  0x5b   : > { %p730_p0 = pneg %p729_p11  ;;  %p736_p13 = por %p735_p4, %p734_p7 }
  0x5d   : > { %p737_p6 = pnand %p736_p13, %p730_p0 }
  0x5f   : > { %740 = shalt.err (!%p737_p6)
}
  0x60   : > { %579 = dma.hbm_to_vmem [thread:$0]  (!%p1007_p2), %s1003_s6, 64, %s1011_s7, %s173_s26  }
  0x61   : > { %193 = sbr.rel (%p910_p8) target bundleno = 349 (0x15d), region = 32  ;;  %s1041_s9 = sand.u32 (!%p910_p8), 1, %s811_s13  }
  0x62   : > { %s533_s10 = sshll.u32 (!%p910_p8), %s1041_s9, 2  ;;  %s196_s18 = scalar_lea.sflag (!%p910_p8), [#allocation3], %s1041_s9 }
  0x63   : > { %s199_s19 = scalar_lea.vmem (!%p910_p8), [#allocation2], %s533_s10  ;;  %p1123_p7 = scmp.ne.s32.totalorder (!%p910_p8), %s1117_s22, 0 }
  0x68   : > { %794 = dma.done.wait (%p1123_p7), %s196_s18, 64  }
  0x69   : > { %796 = vsyncadd (%p1123_p7), %s196_s18, 4294967232  ;;  %p1124_p12 = scmp.ne.s32.totalorder %s1115_s20, 0 }
  0x6b   : > { %798 = dma.done.wait (%p1124_p12), [#allocation6], 1088  }
  0x6c   : > { %800 = vsyncadd (%p1124_p12), [#allocation6], 4294966208  ;;  %v834_v0 = vmov 0   ;;  %v643_v1 = vld [vmem:[#allocation5 + $0x4] ss:$16 sps:$4 sm:$0xff]   ;;  %vm302_vm0 = vcmask 261120   ;;  %v242_v10 = vlaneseq }
  0x6d   : > { %338 = vmatprep.mubr.bf16.mxu0 %v834_v0  ;;  %379 = vmatprep.mubr.bf16.mxu1 %v834_v0  ;;  %v645_v2 = vld [vmem:[#allocation5 + $0xc] ss:$16 sps:$4 sm:$0xff]   ;;  %v647_v3 = vld [vmem:[#allocation5] ss:$16 sps:$4 sm:$0xff]   ;;  %v648_v4 = vld [vmem:[#allocation5 + $0x8] ss:$16 sps:$4 sm:$0xff]  }
  0x6e   : > { %306 = vmatprep.subr.bf16.mxu0 %v643_v1  ;;  %347 = vmatprep.subr.bf16.mxu1 %v645_v2  ;;  %v649_v5 = vld [vmem:[#allocation5 + $0x24] ss:$16 sps:$4 sm:$0xff]   ;;  %v651_v6 = vld [vmem:[#allocation5 + $0x2c] ss:$16 sps:$4 sm:$0xff]   ;;  %v653_v7 = vld [vmem:[#allocation5 + $0x20] ss:$16 sps:$4 sm:$0xff]  }
  0x6f   : > { %307 = vmatpush1.bf16.msra.mxu0 %v647_v3  ;;  %348 = vmatpush1.bf16.msra.mxu1 %v648_v4  ;;  %v654_v8 = vld [vmem:[#allocation5 + $0x28] ss:$16 sps:$4 sm:$0xff]   ;;  %v243_v11 = vshrl.u32 %v242_v10, 7  ;;  %v240_v14 = vld [vmem:[#allocation7] sm:$0xf]  ;;  %s536_s20 = sshll.u32 %s1041_s9, 4 }
  0x70   : > { %308 = vmatprep.subr.bf16.mxu0 %v649_v5  ;;  %349 = vmatprep.subr.bf16.mxu1 %v651_v6  ;;  %v231_v9 = vld [vmem:[%s199_s19] sm:$0xf]  ;;  %s556_s22 = sshll.u32 %s819_s15, 8  ;;  %s229_s24 = scalar_lea.vmem [#allocation8], %s536_s20 }
  0x71   : > { %v244_v12 = vsub.s32 0, %v243_v11  ;;  %v252_v13 = vsub.s32 2, %v243_v11  ;;  %v248_v15 = vsub.s32 1, %v243_v11  ;;  %v256_v16 = vsub.s32 3, %v243_v11  ;;  %s423_s6 = sshll.u32 %s229_s24, 4  ;;  %s1058_s26 = scalar_lea.hbm %s1110_s3, %s556_s22  ;;  %s1060_s6 = int_to_ptr.vmem [resolvable:$true] %s423_s6 }
  0x72   : > { %s407_s15 = scalar_lea.sflag [#allocation4], %s1041_s9  ;;  %s741_s29 = scalar_lea.vmem %s1060_s6, 256 }
  0x73   : > { %309 = vmatpush1.bf16.msra.mxu0 %v653_v7  ;;  %350 = vmatpush1.bf16.msra.mxu1 %v654_v8  ;;  %v245_v17 = vrot.slane %v240_v14, %v244_v12  ;;  %v253_v18 = vrot.slane %v240_v14, %v252_v13  ;;  %v249_v19 = vrot.slane %v240_v14, %v248_v15  ;;  %p742_p8 = scmp.ne.s32.totalorder %s1060_s6, %s741_s29  ;;  %p1125_p2 = scmp.ne.s32.totalorder %s1121_s27, 0 }
  0x74   : > { %v257_v20 = vrot.slane %v240_v14, %v256_v16  ;;  %s835_s28 = smov [#allocation8]  }
  0x75   : > { %p743_p1 = pnand %p742_p8, %p1125_p2  ;;  %s745_s25 = sshll.u32 %s835_s28, 4  ;;  %s746_s25 = int_to_ptr.vmem [resolvable:$false] %s745_s25 }
  0x76   : > { %545 = vmatmul.mubr.msk.bf16.vlgmr.msra.gmra.mrb[0].mxu0 %vm302_vm0, %v231_v9  ;;  %546 = vmatmul.mubr.msk.bf16.vlgmr.msra.gmra.mrb[0].mxu1 %vm302_vm0, %v231_v9  ;;  %s747_s4 = scalar_lea.vmem %s746_s25, 512  ;;  %p748_p3 = scmp.lt.s32.totalorder %s1060_s6, %s746_s25 }
  0x77   : > { %p744_p10 = pneg %p743_p1  ;;  %p749_p5 = scmp.lt.s32.totalorder %s747_s4, %s741_s29 }
  0x79   : > { %p750_p9 = por %p749_p5, %p748_p3 }
  0x7b   : > { %p751_p11 = pnand %p750_p9, %p744_p10 }
 0x149   : > { %v340_v21 = vpop.f32.mrb[0].mxu0  ;;  %v381_v22 = vpop.f32.mrb[0].mxu1 }
 0x14a   : > { %v341_v23 = vadd.f32 %v340_v21, %v245_v17  ;;  %v382_v24 = vadd.f32 %v381_v22, %v253_v18  ;;  %v342_v25 = vpop.f32.mrb[1].mxu0  ;;  %v383_v26 = vpop.f32.mrb[1].mxu1 }
 0x14b   : > { %v343_v27 = vadd.f32 %v342_v25, %v249_v19  ;;  %v384_v28 = vadd.f32 %v383_v26, %v257_v20  ;;  %v344_v29 = vpop.f32.mrb[2].mxu0  ;;  %v385_v30 = vpop.f32.mrb[2].mxu1 }
 0x14c   : > { %v345_v31 = vpop.f32.mrb[3].mxu0  ;;  %v386_v32 = vpop.f32.mrb[3].mxu1 }
 0x14d   : > { %v554_v33 = vpack.c.bf16 %v343_v27, %v341_v23  ;;  %v555_v34 = vpack.c.bf16 %v384_v28, %v382_v24 }
 0x14f   : > { %404 = vst [vmem:[%s229_s24] sm:$0xff] %v554_v33  ;;  %405 = vst [vmem:[%s229_s24 + $0x8] sm:$0xff] %v555_v34 }
 0x150   : > { %754 = shalt.err (!%p751_p11)
}
 0x151   : > { %s755_s5 = scalar_lea.hbm %s1058_s26, 256  ;;  %s759_s10 = scalar_lea.hbm %s1110_s3, 512 }
 0x152   : > { %p756_p0 = scmp.ne.s32.totalorder %s1058_s26, %s755_s5  ;;  %p760_p6 = scmp.lt.u32.totalorder %s1058_s26, %s1110_s3 }
 0x153   : > { %p761_p7 = scmp.lt.u32.totalorder %s759_s10, %s755_s5  ;;  %p763_p8 = scmp.lt.u32.totalorder %s755_s5, %s1058_s26 }
 0x154   : > { %p757_p4 = pnand %p756_p0, %p1125_p2 }
 0x155   : > { %p762_p12 = por %p761_p7, %p760_p6 }
 0x156   : > { %p758_p13 = pneg %p757_p4 }
 0x157   : > { %p764_p1 = por %p763_p8, %p762_p12 }
 0x159   : > { %p765_p10 = pnand %p764_p1, %p758_p13 }
 0x15b   : > { %768 = shalt.err (!%p765_p10)
}
 0x15c   : > { %567 = dma.vmem_to_hbm [thread:$0]  (%p1125_p2), %s1060_s6, 256, %s1058_s26, %s407_s15  }
 0x15d PF: > { %s435_s20 = sand.u32 1, %s807_s12   ;;  %p1126_p3 = scmp.ne.s32.totalorder %s1118_s23, 0 }
 0x15e   : > { %p1127_p5 = scmp.ge.s32.totalorder %s827_s17, 2  ;;  %s436_s22 = scalar_lea.sflag [#allocation4], %s435_s20 }
 0x160   : > { %p581_p9 = pnand %p1127_p5, %p1126_p3 }
 0x162   : > { %802 = dma.done.wait (!%p581_p9), %s436_s22, 256  }
 0x163   : > { %804 = vsyncadd (!%p581_p9), %s436_s22, 4294967040  ;;  %s20_s17 = sadd.s32 1, %s827_s17   ;;  %s1128_s12 = smov %s811_s13 }
 0x164   : > { %p17_p11 = scmp.ge.s32.totalorder %s20_s17, 4   ;;  %s1129_s13 = smov %s815_s14 }
 0x165   : > { %s1130_s14 = smov %s998_s30  ;;  %s1131_s15 = smov %s823_s16 }
 0x166   : > { %s1132_s16 = smov %s1134_s11  ;;  %19 = sbr.rel (!%p17_p11) target bundleno = 7 (0x7), region = 85 }
 0x16d   :  { %441 = vsyncpa [#allocation3], 1 }
 0x16e   :  { %443 = vsyncpa [#allocation3 + $0x1], 1 }
 0x16f   :  { %444 = vsyncpa [#allocation6], 1 }
 0x170   :  { %445 = vsyncpa [#allocation4], 1 }
 0x171   :  { %447 = vsyncpa [#allocation4 + $0x1], 1 }

</bundles_post_ra>
